<compile_context>
chip_gen: v5e
topology: v5e:2x2
jax: 0.10.0
libtpu: 0.0.40
codegen_flags: <defaults>
</compile_context>

<pallas_src>
import functools

import jax
import jax.numpy as jnp
from jax.experimental import pallas as pl
from jax.experimental.pallas import tpu as pltpu

BN_EPS = 1e-5


def _make_kernel(z_scale, is_conditional, conditioning_method, n_conditions):
    """Builds the Pallas kernel body with hyper-params baked in."""

    def body(x, w_refs, gamma_ref, beta_ref, o_ref):
        n_inv = jnp.float32(1.0 / x.shape[0])

        def bn_relu(h, idx):
            # One-pass batch stats (biased variance), BN folded to scale/bias:
            #   scale = gamma * rsqrt(var + eps);  bias = beta - mean * scale
            #   hn    = h * scale + bias;          out = relu(hn)
            # TODO(synk): switch to two-pass / Welford stats if activation
            # magnitudes ever grow beyond toy scale (cancellation risk).
            mean = jnp.sum(h, axis=0, keepdims=True) * n_inv
            e2 = jnp.sum(h * h, axis=0, keepdims=True) * n_inv
            var = jnp.maximum(e2 - mean * mean, jnp.float32(0.0))
            scale = gamma_ref[idx:idx + 1, :] * jax.lax.rsqrt(
                var + jnp.float32(BN_EPS))
            bias = beta_ref[idx:idx + 1, :] - mean * scale
            return jnp.maximum(h * scale + bias, jnp.float32(0.0))

        h = x
        for idx in range(4):  # conv1x1 -> BN -> ReLU, four times
            h = bn_relu(
                jnp.dot(h.astype(jnp.bfloat16), w_refs[idx][...],
                        preferred_element_type=jnp.float32),
                idx)
        # Final conv1x1.  Output kept at natural (N, nc) width: at nc=4 a
        # masked vst is far cheaper than 32x-padded HBM writeback + a slice.
        o_ref[...] = jnp.dot(h.astype(jnp.bfloat16), w_refs[4][...],
                             preferred_element_type=jnp.float32)

    if is_conditional:
        def kernel(y_ref, z_ref, emb_ref, w1, w2, w3, w4, w5,
                   gamma_ref, beta_ref, o_ref):
            # In-kernel embedding gather: one-hot(y) @ label_emb on the MXU.
            # (For 'mul', z_scale is pre-folded into label_emb by the wrapper.)
            n = z_ref.shape[0]
            iota = jax.lax.broadcasted_iota(jnp.int32, (n, n_conditions), 1)
            onehot = (iota == y_ref[...]).astype(jnp.bfloat16)
            e = jnp.dot(onehot, emb_ref[...],
                        preferred_element_type=jnp.float32)
            z = z_ref[...]
            if conditioning_method == "mul":
                x = z * e
            elif conditioning_method == "add":
                x = z * jnp.float32(z_scale) + e
            else:
                raise ValueError(conditioning_method)
            body(x, (w1, w2, w3, w4, w5), gamma_ref, beta_ref, o_ref)
        return kernel
    else:
        def kernel(z_ref, w1, w2, w3, w4, w5, gamma_ref, beta_ref, o_ref):
            # z_scale is pre-folded into w1 by the wrapper.
            body(z_ref[...], (w1, w2, w3, w4, w5),
                 gamma_ref, beta_ref, o_ref)
        return kernel


def init_params(key, nz, ngf, nc, n_conditions):
    """Deterministic synthetic parameter init (shapes match the PyTorch module).

    BN gamma/beta are randomized (PyTorch default is ones/zeros) purely so the
    affine path is exercised by the check; semantics are identical.
    """
    ks = jax.random.split(key, 8)
    scale = 0.1
    params = {
        # ConvTranspose2d weights (Cin, Cout, 1, 1) stored squeezed as (Cin, Cout)
        "w1": scale * jax.random.normal(ks[0], (nz, ngf), jnp.float32),
        "w2": scale * jax.random.normal(ks[1], (ngf, ngf), jnp.float32),
        "w3": scale * jax.random.normal(ks[2], (ngf, ngf), jnp.float32),
        "w4": scale * jax.random.normal(ks[3], (ngf, ngf), jnp.float32),
        "w5": scale * jax.random.normal(ks[4], (ngf, nc), jnp.float32),
        # 4 BatchNorm2d layers
        "bn_gamma": 1.0 + 0.1 * jax.random.normal(ks[5], (4, ngf), jnp.float32),
        "bn_beta": 0.1 * jax.random.normal(ks[6], (4, ngf), jnp.float32),
        # nn.Embedding(n_conditions, nz), default init ~ N(0, 1)
        "label_emb": jax.random.normal(ks[7], (n_conditions, nz), jnp.float32),
    }
    return params


@functools.partial(
    jax.jit,
    static_argnames=("z_scale", "is_conditional", "conditioning_method"),
)
def conditional_generator_toy_forward(params, z, y, *, z_scale, is_conditional,
                                      conditioning_method):
    """Forward pass of ConditionalGeneratorToy.

    z: (N, nz) float32 latent
    y: (N,) int32 labels (only used when is_conditional)
    returns: (N, nc, 1, 1) float32, matching the PyTorch NCHW output.
    """
    N, nz = z.shape
    ngf, nc = params["w5"].shape
    n_conditions = params["label_emb"].shape[0]

    bf16 = jnp.bfloat16
    f32 = jnp.float32

    # Fold z_scale into the first linear operand where algebra allows.
    w1 = params["w1"].astype(f32)
    emb = params["label_emb"].astype(f32)
    if is_conditional:
        if conditioning_method == "mul":
            emb = emb * f32(z_scale)      # (z*s)*e == z*(s*e)
    else:
        w1 = w1 * f32(z_scale)            # (z*s)@w1 == z@(s*w1)

    weights = (
        w1.astype(bf16),
        params["w2"].astype(bf16),
        params["w3"].astype(bf16),
        params["w4"].astype(bf16),
        params["w5"].astype(bf16),
    )

    kernel = _make_kernel(z_scale, is_conditional, conditioning_method,
                          n_conditions)
    vmem = pl.BlockSpec(memory_space=pltpu.MemorySpace.VMEM)

    if is_conditional:
        args = (
            y.reshape(N, 1).astype(jnp.int32),
            z.astype(f32),
            emb.astype(bf16),
        ) + weights + (params["bn_gamma"].astype(f32),
                       params["bn_beta"].astype(f32))
    else:
        args = (z.astype(f32),) + weights + (
            params["bn_gamma"].astype(f32), params["bn_beta"].astype(f32))

    out = pl.pallas_call(
        kernel,
        out_shape=jax.ShapeDtypeStruct((N, nc), jnp.float32),
        in_specs=[vmem] * len(args),
        out_specs=vmem,
        compiler_params=pltpu.CompilerParams(
            vmem_limit_bytes=32 * 1024 * 1024),
    )(*args)

    # Reshape back to NCHW (N, nc, 1, 1).
    return out.reshape(N, nc, 1, 1)


def _reference_forward(params, z, y, *, z_scale, is_conditional,
                       conditioning_method, matmul_dtype=jnp.float32):
    """Pure-JAX reference.

    With matmul_dtype=float32 this is the PyTorch (training-mode BN) forward;
    with matmul_dtype=bfloat16 it mirrors the kernel's MXU dtype exactly.
    """
    f32 = jnp.float32

    def mm(a, b):
        return jnp.dot(a.astype(matmul_dtype), b.astype(matmul_dtype),
                       preferred_element_type=f32)

    w1 = params["w1"].astype(f32)
    emb = params["label_emb"].astype(f32)
    if is_conditional:
        if conditioning_method == "mul":
            emb = emb * f32(z_scale)
        e = emb.astype(matmul_dtype).astype(f32)[y]
        if conditioning_method == "mul":
            x = z * e
        elif conditioning_method == "add":
            x = z * f32(z_scale) + e
        else:
            raise ValueError(conditioning_method)
    else:
        w1 = w1 * f32(z_scale)
        x = z

    h = x
    for i, w in enumerate((w1, params["w2"], params["w3"], params["w4"])):
        h = mm(h, w)
        mean = h.mean(0, keepdims=True)
        e2 = (h * h).mean(0, keepdims=True)
        var = jnp.maximum(e2 - mean * mean, 0.0)
        scale = params["bn_gamma"][i] * jax.lax.rsqrt(var + f32(BN_EPS))
        bias = params["bn_beta"][i] - mean * scale
        h = jnp.maximum(h * scale + bias, 0.0)
    out = mm(h, params["w5"])
    return out.reshape(z.shape[0], -1, 1, 1)


if __name__ == "__main__":
    # small shapes consistent with the toy generator
    N = 8            # batch
    nz = 32          # latent dim
    ngf = 32         # hidden width
    nc = 4           # output channels
    n_conditions = 10
    z_scale = 2.0

    key = jax.random.PRNGKey(0)
    k_param, k_z, k_y = jax.random.split(key, 3)

    params = init_params(k_param, nz, ngf, nc, n_conditions)
    z = jax.random.normal(k_z, (N, nz), jnp.float32)
    y = jax.random.randint(k_y, (N,), 0, n_conditions, jnp.int32)

    configs = [
        dict(is_conditional=True, conditioning_method="mul"),
        dict(is_conditional=True, conditioning_method="add"),
        dict(is_conditional=False, conditioning_method="mul"),
    ]

    for cfg in configs:
        out = conditional_generator_toy_forward(
            params, z, y, z_scale=z_scale, **cfg)
        jax.block_until_ready(out)

        assert out.shape == (N, nc, 1, 1), out.shape
        assert out.dtype == jnp.float32, out.dtype

        # Tight check against a reference that mirrors the kernel's bf16 MXU
        # operands (validates the Pallas plumbing itself).
        ref_bf16 = _reference_forward(
            params, z, y, z_scale=z_scale, matmul_dtype=jnp.bfloat16, **cfg)
        assert jnp.allclose(out, ref_bf16, rtol=1e-3, atol=1e-3), (
            cfg, float(jnp.max(jnp.abs(out - ref_bf16))))

        # Looser check against the full-f32 PyTorch-semantics reference
        # (bounds the bf16 matmul quantization error).
        ref_f32 = _reference_forward(
            params, z, y, z_scale=z_scale, matmul_dtype=jnp.float32, **cfg)
        assert jnp.allclose(out, ref_f32, rtol=5e-2, atol=5e-2), (
            cfg, float(jnp.max(jnp.abs(out - ref_f32))))

    print("KERNEL_OK")
</pallas_src>

<mosaic_0001>
module attributes {stable_mosaic.version = 11 : i64} {
  func.func @kernel(%arg0: memref<8x1xi32, #tpu.memory_space<vmem>>, %arg1: memref<8x32xf32, #tpu.memory_space<vmem>>, %arg2: memref<10x32xbf16, #tpu.memory_space<vmem>>, %arg3: memref<32x32xbf16, #tpu.memory_space<vmem>>, %arg4: memref<32x32xbf16, #tpu.memory_space<vmem>>, %arg5: memref<32x32xbf16, #tpu.memory_space<vmem>>, %arg6: memref<32x32xbf16, #tpu.memory_space<vmem>>, %arg7: memref<32x4xbf16, #tpu.memory_space<vmem>>, %arg8: memref<4x32xf32, #tpu.memory_space<vmem>>, %arg9: memref<4x32xf32, #tpu.memory_space<vmem>>, %arg10: memref<8x4xf32, #tpu.memory_space<vmem>>) attributes {dimension_semantics = [], scalar_prefetch = 0 : i64, scratch_operands = 0 : i64, tpu.core_type = #tpu.core_type<tc>} {
    %0 = tpu.iota {dimensions = array<i32: 1>} : vector<8x10xi32>
    %c0 = arith.constant 0 : index
    %c0_0 = arith.constant 0 : index
    %1 = vector.load %arg0[%c0, %c0_0] : memref<8x1xi32, #tpu.memory_space<vmem>>, vector<8x1xi32>
    %2 = vector.broadcast %1 : vector<8x1xi32> to vector<8x10xi32>
    %3 = arith.cmpi eq, %0, %2 : vector<8x10xi32>
    %4 = arith.extui %3 : vector<8x10xi1> to vector<8x10xi32>
    %5 = arith.sitofp %4 : vector<8x10xi32> to vector<8x10xf32>
    %6 = arith.truncf %5 : vector<8x10xf32> to vector<8x10xbf16>
    %c0_1 = arith.constant 0 : index
    %c0_2 = arith.constant 0 : index
    %7 = vector.load %arg2[%c0_1, %c0_2] : memref<10x32xbf16, #tpu.memory_space<vmem>>, vector<10x32xbf16>
    %cst = arith.constant dense<0.000000e+00> : vector<8x32xf32>
    %8 = tpu.matmul %6, %7, %cst {dimension_numbers = #tpu.dot_dimension_numbers<[1], [0], [0], [1], [0, 0, 1, 1], [], []>} : vector<8x10xbf16>, vector<10x32xbf16>, vector<8x32xf32> -> vector<8x32xf32>
    %c0_3 = arith.constant 0 : index
    %c0_4 = arith.constant 0 : index
    %9 = vector.load %arg1[%c0_3, %c0_4] : memref<8x32xf32, #tpu.memory_space<vmem>>, vector<8x32xf32>
    %10 = arith.mulf %9, %8 : vector<8x32xf32>
    %11 = arith.truncf %10 : vector<8x32xf32> to vector<8x32xbf16>
    %c0_5 = arith.constant 0 : index
    %c0_6 = arith.constant 0 : index
    %12 = vector.load %arg3[%c0_5, %c0_6] : memref<32x32xbf16, #tpu.memory_space<vmem>>, vector<32x32xbf16>
    %cst_7 = arith.constant dense<0.000000e+00> : vector<8x32xf32>
    %13 = tpu.matmul %11, %12, %cst_7 {dimension_numbers = #tpu.dot_dimension_numbers<[1], [0], [0], [1], [0, 0, 1, 1], [], []>} : vector<8x32xbf16>, vector<32x32xbf16>, vector<8x32xf32> -> vector<8x32xf32>
    %cst_8 = arith.constant dense<0.000000e+00> : vector<32xf32>
    %14 = vector.multi_reduction <add>, %13, %cst_8 [0] : vector<8x32xf32> to vector<32xf32>
    %15 = vector.shape_cast %14 : vector<32xf32> to vector<1x32xf32>
    %cst_9 = arith.constant 1.250000e-01 : f32
    %16 = vector.broadcast %cst_9 : f32 to vector<1x32xf32>
    %17 = arith.mulf %15, %16 : vector<1x32xf32>
    %18 = arith.mulf %13, %13 : vector<8x32xf32>
    %cst_10 = arith.constant dense<0.000000e+00> : vector<32xf32>
    %19 = vector.multi_reduction <add>, %18, %cst_10 [0] : vector<8x32xf32> to vector<32xf32>
    %20 = vector.shape_cast %19 : vector<32xf32> to vector<1x32xf32>
    %cst_11 = arith.constant 1.250000e-01 : f32
    %21 = vector.broadcast %cst_11 : f32 to vector<1x32xf32>
    %22 = arith.mulf %20, %21 : vector<1x32xf32>
    %23 = arith.mulf %17, %17 : vector<1x32xf32>
    %24 = arith.subf %22, %23 : vector<1x32xf32>
    %cst_12 = arith.constant 0.000000e+00 : f32
    %25 = vector.broadcast %cst_12 : f32 to vector<1x32xf32>
    %26 = arith.maximumf %24, %25 : vector<1x32xf32>
    %c0_13 = arith.constant 0 : index
    %c0_14 = arith.constant 0 : index
    %27 = vector.load %arg8[%c0_13, %c0_14] : memref<4x32xf32, #tpu.memory_space<vmem>>, vector<1x32xf32>
    %cst_15 = arith.constant 9.99999974E-6 : f32
    %28 = vector.broadcast %cst_15 : f32 to vector<1x32xf32>
    %29 = arith.addf %26, %28 : vector<1x32xf32>
    %30 = math.rsqrt %29 : vector<1x32xf32>
    %31 = arith.mulf %27, %30 : vector<1x32xf32>
    %c0_16 = arith.constant 0 : index
    %c0_17 = arith.constant 0 : index
    %32 = vector.load %arg9[%c0_16, %c0_17] : memref<4x32xf32, #tpu.memory_space<vmem>>, vector<1x32xf32>
    %33 = arith.mulf %17, %31 : vector<1x32xf32>
    %34 = arith.subf %32, %33 : vector<1x32xf32>
    %35 = vector.broadcast %31 : vector<1x32xf32> to vector<8x32xf32>
    %36 = arith.mulf %13, %35 : vector<8x32xf32>
    %37 = vector.broadcast %34 : vector<1x32xf32> to vector<8x32xf32>
    %38 = arith.addf %36, %37 : vector<8x32xf32>
    %cst_18 = arith.constant 0.000000e+00 : f32
    %39 = vector.broadcast %cst_18 : f32 to vector<8x32xf32>
    %40 = arith.maximumf %38, %39 : vector<8x32xf32>
    %41 = arith.truncf %40 : vector<8x32xf32> to vector<8x32xbf16>
    %c0_19 = arith.constant 0 : index
    %c0_20 = arith.constant 0 : index
    %42 = vector.load %arg4[%c0_19, %c0_20] : memref<32x32xbf16, #tpu.memory_space<vmem>>, vector<32x32xbf16>
    %cst_21 = arith.constant dense<0.000000e+00> : vector<8x32xf32>
    %43 = tpu.matmul %41, %42, %cst_21 {dimension_numbers = #tpu.dot_dimension_numbers<[1], [0], [0], [1], [0, 0, 1, 1], [], []>} : vector<8x32xbf16>, vector<32x32xbf16>, vector<8x32xf32> -> vector<8x32xf32>
    %cst_22 = arith.constant dense<0.000000e+00> : vector<32xf32>
    %44 = vector.multi_reduction <add>, %43, %cst_22 [0] : vector<8x32xf32> to vector<32xf32>
    %45 = vector.shape_cast %44 : vector<32xf32> to vector<1x32xf32>
    %cst_23 = arith.constant 1.250000e-01 : f32
    %46 = vector.broadcast %cst_23 : f32 to vector<1x32xf32>
    %47 = arith.mulf %45, %46 : vector<1x32xf32>
    %48 = arith.mulf %43, %43 : vector<8x32xf32>
    %cst_24 = arith.constant dense<0.000000e+00> : vector<32xf32>
    %49 = vector.multi_reduction <add>, %48, %cst_24 [0] : vector<8x32xf32> to vector<32xf32>
    %50 = vector.shape_cast %49 : vector<32xf32> to vector<1x32xf32>
    %cst_25 = arith.constant 1.250000e-01 : f32
    %51 = vector.broadcast %cst_25 : f32 to vector<1x32xf32>
    %52 = arith.mulf %50, %51 : vector<1x32xf32>
    %53 = arith.mulf %47, %47 : vector<1x32xf32>
    %54 = arith.subf %52, %53 : vector<1x32xf32>
    %cst_26 = arith.constant 0.000000e+00 : f32
    %55 = vector.broadcast %cst_26 : f32 to vector<1x32xf32>
    %56 = arith.maximumf %54, %55 : vector<1x32xf32>
    %c1 = arith.constant 1 : index
    %c0_27 = arith.constant 0 : index
    %57 = vector.load %arg8[%c1, %c0_27] : memref<4x32xf32, #tpu.memory_space<vmem>>, vector<1x32xf32>
    %cst_28 = arith.constant 9.99999974E-6 : f32
    %58 = vector.broadcast %cst_28 : f32 to vector<1x32xf32>
    %59 = arith.addf %56, %58 : vector<1x32xf32>
    %60 = math.rsqrt %59 : vector<1x32xf32>
    %61 = arith.mulf %57, %60 : vector<1x32xf32>
    %c1_29 = arith.constant 1 : index
    %c0_30 = arith.constant 0 : index
    %62 = vector.load %arg9[%c1_29, %c0_30] : memref<4x32xf32, #tpu.memory_space<vmem>>, vector<1x32xf32>
    %63 = arith.mulf %47, %61 : vector<1x32xf32>
    %64 = arith.subf %62, %63 : vector<1x32xf32>
    %65 = vector.broadcast %61 : vector<1x32xf32> to vector<8x32xf32>
    %66 = arith.mulf %43, %65 : vector<8x32xf32>
    %67 = vector.broadcast %64 : vector<1x32xf32> to vector<8x32xf32>
    %68 = arith.addf %66, %67 : vector<8x32xf32>
    %cst_31 = arith.constant 0.000000e+00 : f32
    %69 = vector.broadcast %cst_31 : f32 to vector<8x32xf32>
    %70 = arith.maximumf %68, %69 : vector<8x32xf32>
    %71 = arith.truncf %70 : vector<8x32xf32> to vector<8x32xbf16>
    %c0_32 = arith.constant 0 : index
    %c0_33 = arith.constant 0 : index
    %72 = vector.load %arg5[%c0_32, %c0_33] : memref<32x32xbf16, #tpu.memory_space<vmem>>, vector<32x32xbf16>
    %cst_34 = arith.constant dense<0.000000e+00> : vector<8x32xf32>
    %73 = tpu.matmul %71, %72, %cst_34 {dimension_numbers = #tpu.dot_dimension_numbers<[1], [0], [0], [1], [0, 0, 1, 1], [], []>} : vector<8x32xbf16>, vector<32x32xbf16>, vector<8x32xf32> -> vector<8x32xf32>
    %cst_35 = arith.constant dense<0.000000e+00> : vector<32xf32>
    %74 = vector.multi_reduction <add>, %73, %cst_35 [0] : vector<8x32xf32> to vector<32xf32>
    %75 = vector.shape_cast %74 : vector<32xf32> to vector<1x32xf32>
    %cst_36 = arith.constant 1.250000e-01 : f32
    %76 = vector.broadcast %cst_36 : f32 to vector<1x32xf32>
    %77 = arith.mulf %75, %76 : vector<1x32xf32>
    %78 = arith.mulf %73, %73 : vector<8x32xf32>
    %cst_37 = arith.constant dense<0.000000e+00> : vector<32xf32>
    %79 = vector.multi_reduction <add>, %78, %cst_37 [0] : vector<8x32xf32> to vector<32xf32>
    %80 = vector.shape_cast %79 : vector<32xf32> to vector<1x32xf32>
    %cst_38 = arith.constant 1.250000e-01 : f32
    %81 = vector.broadcast %cst_38 : f32 to vector<1x32xf32>
    %82 = arith.mulf %80, %81 : vector<1x32xf32>
    %83 = arith.mulf %77, %77 : vector<1x32xf32>
    %84 = arith.subf %82, %83 : vector<1x32xf32>
    %cst_39 = arith.constant 0.000000e+00 : f32
    %85 = vector.broadcast %cst_39 : f32 to vector<1x32xf32>
    %86 = arith.maximumf %84, %85 : vector<1x32xf32>
    %c2 = arith.constant 2 : index
    %c0_40 = arith.constant 0 : index
    %87 = vector.load %arg8[%c2, %c0_40] : memref<4x32xf32, #tpu.memory_space<vmem>>, vector<1x32xf32>
    %cst_41 = arith.constant 9.99999974E-6 : f32
    %88 = vector.broadcast %cst_41 : f32 to vector<1x32xf32>
    %89 = arith.addf %86, %88 : vector<1x32xf32>
    %90 = math.rsqrt %89 : vector<1x32xf32>
    %91 = arith.mulf %87, %90 : vector<1x32xf32>
    %c2_42 = arith.constant 2 : index
    %c0_43 = arith.constant 0 : index
    %92 = vector.load %arg9[%c2_42, %c0_43] : memref<4x32xf32, #tpu.memory_space<vmem>>, vector<1x32xf32>
    %93 = arith.mulf %77, %91 : vector<1x32xf32>
    %94 = arith.subf %92, %93 : vector<1x32xf32>
    %95 = vector.broadcast %91 : vector<1x32xf32> to vector<8x32xf32>
    %96 = arith.mulf %73, %95 : vector<8x32xf32>
    %97 = vector.broadcast %94 : vector<1x32xf32> to vector<8x32xf32>
    %98 = arith.addf %96, %97 : vector<8x32xf32>
    %cst_44 = arith.constant 0.000000e+00 : f32
    %99 = vector.broadcast %cst_44 : f32 to vector<8x32xf32>
    %100 = arith.maximumf %98, %99 : vector<8x32xf32>
    %101 = arith.truncf %100 : vector<8x32xf32> to vector<8x32xbf16>
    %c0_45 = arith.constant 0 : index
    %c0_46 = arith.constant 0 : index
    %102 = vector.load %arg6[%c0_45, %c0_46] : memref<32x32xbf16, #tpu.memory_space<vmem>>, vector<32x32xbf16>
    %cst_47 = arith.constant dense<0.000000e+00> : vector<8x32xf32>
    %103 = tpu.matmul %101, %102, %cst_47 {dimension_numbers = #tpu.dot_dimension_numbers<[1], [0], [0], [1], [0, 0, 1, 1], [], []>} : vector<8x32xbf16>, vector<32x32xbf16>, vector<8x32xf32> -> vector<8x32xf32>
    %cst_48 = arith.constant dense<0.000000e+00> : vector<32xf32>
    %104 = vector.multi_reduction <add>, %103, %cst_48 [0] : vector<8x32xf32> to vector<32xf32>
    %105 = vector.shape_cast %104 : vector<32xf32> to vector<1x32xf32>
    %cst_49 = arith.constant 1.250000e-01 : f32
    %106 = vector.broadcast %cst_49 : f32 to vector<1x32xf32>
    %107 = arith.mulf %105, %106 : vector<1x32xf32>
    %108 = arith.mulf %103, %103 : vector<8x32xf32>
    %cst_50 = arith.constant dense<0.000000e+00> : vector<32xf32>
    %109 = vector.multi_reduction <add>, %108, %cst_50 [0] : vector<8x32xf32> to vector<32xf32>
    %110 = vector.shape_cast %109 : vector<32xf32> to vector<1x32xf32>
    %cst_51 = arith.constant 1.250000e-01 : f32
    %111 = vector.broadcast %cst_51 : f32 to vector<1x32xf32>
    %112 = arith.mulf %110, %111 : vector<1x32xf32>
    %113 = arith.mulf %107, %107 : vector<1x32xf32>
    %114 = arith.subf %112, %113 : vector<1x32xf32>
    %cst_52 = arith.constant 0.000000e+00 : f32
    %115 = vector.broadcast %cst_52 : f32 to vector<1x32xf32>
    %116 = arith.maximumf %114, %115 : vector<1x32xf32>
    %c3 = arith.constant 3 : index
    %c0_53 = arith.constant 0 : index
    %117 = vector.load %arg8[%c3, %c0_53] : memref<4x32xf32, #tpu.memory_space<vmem>>, vector<1x32xf32>
    %cst_54 = arith.constant 9.99999974E-6 : f32
    %118 = vector.broadcast %cst_54 : f32 to vector<1x32xf32>
    %119 = arith.addf %116, %118 : vector<1x32xf32>
    %120 = math.rsqrt %119 : vector<1x32xf32>
    %121 = arith.mulf %117, %120 : vector<1x32xf32>
    %c3_55 = arith.constant 3 : index
    %c0_56 = arith.constant 0 : index
    %122 = vector.load %arg9[%c3_55, %c0_56] : memref<4x32xf32, #tpu.memory_space<vmem>>, vector<1x32xf32>
    %123 = arith.mulf %107, %121 : vector<1x32xf32>
    %124 = arith.subf %122, %123 : vector<1x32xf32>
    %125 = vector.broadcast %121 : vector<1x32xf32> to vector<8x32xf32>
    %126 = arith.mulf %103, %125 : vector<8x32xf32>
    %127 = vector.broadcast %124 : vector<1x32xf32> to vector<8x32xf32>
    %128 = arith.addf %126, %127 : vector<8x32xf32>
    %cst_57 = arith.constant 0.000000e+00 : f32
    %129 = vector.broadcast %cst_57 : f32 to vector<8x32xf32>
    %130 = arith.maximumf %128, %129 : vector<8x32xf32>
    %131 = arith.truncf %130 : vector<8x32xf32> to vector<8x32xbf16>
    %c0_58 = arith.constant 0 : index
    %c0_59 = arith.constant 0 : index
    %132 = vector.load %arg7[%c0_58, %c0_59] : memref<32x4xbf16, #tpu.memory_space<vmem>>, vector<32x4xbf16>
    %cst_60 = arith.constant dense<0.000000e+00> : vector<8x4xf32>
    %133 = tpu.matmul %131, %132, %cst_60 {dimension_numbers = #tpu.dot_dimension_numbers<[1], [0], [0], [1], [0, 0, 1, 1], [], []>} : vector<8x32xbf16>, vector<32x4xbf16>, vector<8x4xf32> -> vector<8x4xf32>
    %c0_61 = arith.constant 0 : index
    %c0_62 = arith.constant 0 : index
    %134 = vector.load %arg10[%c0_61, %c0_62] : memref<8x4xf32, #tpu.memory_space<vmem>>, vector<8x4xf32>
    tpu.vector_store %arg10[%c0_61, %c0_62], %133 {strides = array<i32>} : memref<8x4xf32, #tpu.memory_space<vmem>>, vector<8x4xf32>,
    return
  }
}

</mosaic_0001>

<bundles_post_ra>
// kernel: conditional_generator_toy_forward.1
= control target key start
LH: loop header
LB: loop body
LE: loop exit
PB: predicated region body
PF: predicated region fallthrough
CT: control target
= control target key end

     0   :  { %v485_v0 = vmov 0   ;;  %vm57_vm0 = vcmask 1044480   ;;  %v36_v7 = vlaneseq  ;;  %v486_v10 = vmov 0.0   ;;  %s624_s0 = inlined_call_operand.vmem [shape: s32[8,1], index: 0, kind: input, shape index: {}]   ;;  %s625_s2 = inlined_call_operand.vmem [shape: bf16[10,32], index: 2, kind: input, shape index: {}]   ;;  %s626_s3 = inlined_call_operand.vmem [shape: bf16[32,32], index: 3, kind: input, shape index: {}]   ;;  %s627_s1 = inlined_call_operand.vmem [shape: f32[8,32], index: 1, kind: input, shape index: {}]   ;;  %s628_s4 = inlined_call_operand.vmem [shape: bf16[32,32], index: 4, kind: input, shape index: {}]   ;;  %s629_s8 = inlined_call_operand.vmem [shape: f32[4,32], index: 8, kind: input, shape index: {}]   ;;  %s630_s9 = inlined_call_operand.vmem [shape: f32[4,32], index: 9, kind: input, shape index: {}]   ;;  %s631_s5 = inlined_call_operand.vmem [shape: bf16[32,32], index: 5, kind: input, shape index: {}]   ;;  %s632_s6 = inlined_call_operand.vmem [shape: bf16[32,32], index: 6, kind: input, shape index: {}]   ;;  %s633_s7 = inlined_call_operand.vmem [shape: bf16[32,4], index: 7, kind: input, shape index: {}]   ;;  %s634_s10 = inlined_call_operand.vmem [shape: f32[8,4], index: 10, kind: output, shape index: {}]  }
   0x1   :  { %476 = vset.pattern.permute.xlu0 %v485_v0  ;;  %v38_v1 = vld [vmem:[%s624_s0] sm:$0xff]  ;;  %v465_v6 = vld [vmem:[%s626_s3 + $0x8] sm:$0xff]  ;;  %vm53_vm2 = vcmask 80896   ;;  %vm93_vm3 = vcmask 261120  }
   0x2   :  { %40 = vperm.xlu0 %476, %v38_v1   ;;  %v415_v2 = vld [vmem:[%s625_s2] sm:$0xf]  ;;  %v463_v3 = vld [vmem:[%s625_s2] sm:$0x10]  ;;  %103 = vmatpush.bf16.msra.mxu1 %v465_v6  ;;  %v37_v8 = vand.u32 127, %v36_v7  ;;  %v467_v37 = vld [vmem:[%s628_s4 + $0x8] sm:$0xff] }
   0x3   :  { %v416_v4 = vor.u32 %v463_v3, %v415_v2  ;;  %v464_v13 = vld [vmem:[%s626_s3] sm:$0xff]  ;;  %177 = vmatpush.bf16.msra.mxu2 %v467_v37 }
   0x4   :  { %v74_v14 = vld [vmem:[%s627_s1] sm:$0xff] }
   0x5   :  { %v59_v5 = vsel %vm57_vm0, %v416_v4, 0  ;;  %v466_v40 = vld [vmem:[%s628_s4] sm:$0xff]  ;;  %vm406_vm0 = vcmask 31744  }
   0x6   :  { %68 = vmatpush.bf16.msra.mxu0 %v59_v5  ;;  %104 = vmatpush.bf16.msra.mxu1 %v464_v13  ;;  %v130_v49 = vld [vmem:[%s629_s8] sm:$0x1] }
   0x7   :  { %178 = vmatpush.bf16.msra.mxu2 %v466_v40  ;;  %v143_v53 = vld [vmem:[%s630_s9] sm:$0x1] }
  0x74   :  { %v41_v9 = vpop.permute.xlu0 %40 }
  0x75   :  { %vm42_vm1 = vcmp.eq.s32.totalorder %v37_v8, %v41_v9 }
  0x76   :  { %v412_v11 = vsel %vm42_vm1, 1.0, %v486_v10 }
  0x77   :  { %v45_v12 = vpack.c.bf16 %v412_v11, %v412_v11 }
  0x79   :  { %417 = vmatmul.msk.bf16.vlgmr.msra.gmra.mxu0 %vm53_vm2, %v45_v12 }
  0xf6   :  { %v70_v15 = vpop.f32.mrf.mxu0 }
  0xf7   :  { %v75_v16 = vmul.f32 %v74_v14, %v70_v15 }
  0xf9   :  { %v76_v17 = vpack.c.bf16 %v75_v16, %v75_v16  ;;  %v469_v16 = vld [vmem:[%s631_s5 + $0x8] sm:$0xff] }
  0xfa   :  { %251 = vmatpush.bf16.msra.mxu3 %v469_v16 }
  0xfb   :  { %426 = vmatmul.msk.bf16.vlgmr.msra.gmra.mxu1 %vm93_vm3, %v76_v17 }
  0xfe   :  { %v72_v18 = vpop.f32.mrf.mxu0 }
 0x178   :  { %v106_v19 = vpop.f32.mrf.mxu1 }
 0x179   :  { %v110_v20 = vsel %vm93_vm3, %v106_v19, 0.0  ;;  %v118_v21 = vmul.f32 %v106_v19, %v106_v19 }
 0x17a   :  { %v111_v22 = vrot.slane %v110_v20, 4 }
 0x17b   :  { %v119_v23 = vsel %vm93_vm3, %v118_v21, 0.0 }
 0x17c   :  { %v112_v24 = vadd.f32 %v111_v22, %v110_v20  ;;  %v120_v25 = vrot.slane %v119_v23, 4 }
 0x17e   :  { %v113_v26 = vrot.slane %v112_v24, 2  ;;  %v121_v27 = vadd.f32 %v120_v25, %v119_v23 }
 0x180   :  { %v114_v28 = vadd.f32 %v113_v26, %v112_v24  ;;  %v122_v29 = vrot.slane %v121_v27, 2  ;;  %v108_v30 = vpop.f32.mrf.mxu1 }
 0x182   :  { %v115_v31 = vrot.slane %v114_v28, 1  ;;  %v123_v32 = vadd.f32 %v122_v29, %v121_v27 }
 0x184   :  { %v116_v33 = vadd.f32 %v115_v31, %v114_v28  ;;  %v124_v34 = vrot.slane %v123_v32, 1  ;;  %v204_v28 = vld [vmem:[%s629_s8 + $0x1] sm:$0x1] }
 0x186   :  { %v117_v35 = vmul.f32 0.125, %v116_v33  ;;  %v125_v36 = vadd.f32 %v124_v34, %v123_v32  ;;  %v217_v32 = vld [vmem:[%s630_s9 + $0x1] sm:$0x1] }
 0x188   :  { %v126_v38 = vmul.f32 0.125, %v125_v36  ;;  %v127_v39 = vmul.f32 %v117_v35, %v117_v35 }
 0x18a   :  { %v128_v41 = vsub.f32 %v126_v38, %v127_v39 }
 0x18c   :  { %v129_v42 = vmax.f32 %v128_v41, 0.0 }
 0x18e   :  { %v131_v43 = vadd.f32 1e-05, %v129_v42 }
 0x190   :  { %477 = vrsqrt.f32 %v131_v43  ;;  %vm138_vm5 = vweird.f32 %v131_v43 }
 0x196   :  { %v478_v44 = vpop.eup %477 }
 0x197   :  { %v133_v45 = vmul.f32 %v478_v44, %v131_v43  ;;  %vm139_vm4 = vweird.f32 %v478_v44 }
 0x198   :  { %vm140_vm6 = vmor %vm138_vm5, %vm139_vm4 }
 0x199   :  { %v134_v46 = vmul.f32 %v478_v44, %v133_v45 }
 0x19b   :  { %v135_v47 = vmul.f32 0.5, %v134_v46 }
 0x19d   :  { %v136_v48 = vsub.f32 1.5, %v135_v47 }
 0x19f   :  { %v137_v50 = vmul.f32 %v478_v44, %v136_v48 }
 0x1a1   :  { %v141_v51 = vsel %vm140_vm6, %v478_v44, %v137_v50 }
 0x1a2   :  { %v142_v52 = vmul.f32 %v141_v51, %v130_v49 }
 0x1a4   :  { %v146_v54 = vperm.slane %v142_v52, 0  ;;  %v144_v55 = vmul.f32 %v142_v52, %v117_v35 }
 0x1a6   :  { %v145_v56 = vsub.f32 %v143_v53, %v144_v55  ;;  %v147_v57 = vmul.f32 %v146_v54, %v106_v19  ;;  %v468_v19 = vld [vmem:[%s631_s5] sm:$0xff] }
 0x1a7   :  { %252 = vmatpush.bf16.msra.mxu3 %v468_v19 }
 0x1a8   :  { %v148_v58 = vperm.slane %v145_v56, 0 }
 0x1aa   :  { %v149_v59 = vadd.f32 %v148_v58, %v147_v57 }
 0x1ac   :  { %v150_v60 = vmax.f32 %v149_v59, 0.0  ;;  %v471_v59 = vld [vmem:[%s632_s6 + $0x8] sm:$0xff] }
 0x1ad   :  { %325 = vmatpush.bf16.msrb.mxu0 %v471_v59 }
 0x1ae   :  { %v151_v61 = vpack.c.bf16 %v150_v60, %v150_v60 }
 0x1b0   :  { %435 = vmatmul.msk.bf16.vlgmr.msra.gmra.mxu2 %vm93_vm3, %v151_v61 }
 0x233   :  { %v180_v62 = vpop.f32.mrf.mxu2 }
 0x234   :  { %v184_v63 = vsel %vm93_vm3, %v180_v62, 0.0  ;;  %v192_v0 = vmul.f32 %v180_v62, %v180_v62 }
 0x235   :  { %v185_v1 = vrot.slane %v184_v63, 4 }
 0x236   :  { %v193_v2 = vsel %vm93_vm3, %v192_v0, 0.0 }
 0x237   :  { %v186_v3 = vadd.f32 %v185_v1, %v184_v63  ;;  %v194_v4 = vrot.slane %v193_v2, 4  ;;  %v470_v63 = vld [vmem:[%s632_s6] sm:$0xff] }
 0x238   :  { %326 = vmatpush.bf16.msrb.mxu0 %v470_v63 }
 0x239   :  { %v187_v5 = vrot.slane %v186_v3, 2  ;;  %v195_v6 = vadd.f32 %v194_v4, %v193_v2 }
 0x23b   :  { %v188_v7 = vadd.f32 %v187_v5, %v186_v3  ;;  %v196_v8 = vrot.slane %v195_v6, 2  ;;  %v182_v9 = vpop.f32.mrf.mxu2 }
 0x23d   :  { %v189_v10 = vrot.slane %v188_v7, 1  ;;  %v197_v11 = vadd.f32 %v196_v8, %v195_v6 }
 0x23f   :  { %v190_v12 = vadd.f32 %v189_v10, %v188_v7  ;;  %v198_v13 = vrot.slane %v197_v11, 1  ;;  %v278_v7 = vld [vmem:[%s629_s8 + $0x2] sm:$0x1] }
 0x241   :  { %v191_v14 = vmul.f32 0.125, %v190_v12  ;;  %v199_v15 = vadd.f32 %v198_v13, %v197_v11  ;;  %v291_v11 = vld [vmem:[%s630_s9 + $0x2] sm:$0x1] }
 0x243   :  { %v200_v17 = vmul.f32 0.125, %v199_v15  ;;  %v201_v18 = vmul.f32 %v191_v14, %v191_v14 }
 0x245   :  { %v202_v20 = vsub.f32 %v200_v17, %v201_v18 }
 0x247   :  { %v203_v21 = vmax.f32 %v202_v20, 0.0 }
 0x249   :  { %v205_v22 = vadd.f32 1e-05, %v203_v21 }
 0x24b   :  { %479 = vrsqrt.f32 %v205_v22  ;;  %vm212_vm8 = vweird.f32 %v205_v22 }
 0x251   :  { %v480_v23 = vpop.eup %479 }
 0x252   :  { %v207_v24 = vmul.f32 %v480_v23, %v205_v22  ;;  %vm213_vm7 = vweird.f32 %v480_v23 }
 0x253   :  { %vm214_vm9 = vmor %vm212_vm8, %vm213_vm7 }
 0x254   :  { %v208_v25 = vmul.f32 %v480_v23, %v207_v24 }
 0x256   :  { %v209_v26 = vmul.f32 0.5, %v208_v25 }
 0x258   :  { %v210_v27 = vsub.f32 1.5, %v209_v26 }
 0x25a   :  { %v211_v29 = vmul.f32 %v480_v23, %v210_v27 }
 0x25c   :  { %v215_v30 = vsel %vm214_vm9, %v480_v23, %v211_v29 }
 0x25d   :  { %v216_v31 = vmul.f32 %v215_v30, %v204_v28 }
 0x25f   :  { %v220_v33 = vperm.slane %v216_v31, 0  ;;  %v218_v34 = vmul.f32 %v216_v31, %v191_v14 }
 0x261   :  { %v219_v35 = vsub.f32 %v217_v32, %v218_v34  ;;  %v221_v36 = vmul.f32 %v220_v33, %v180_v62 }
 0x263   :  { %v222_v37 = vperm.slane %v219_v35, 0 }
 0x265   :  { %v223_v38 = vadd.f32 %v222_v37, %v221_v36 }
 0x267   :  { %v224_v39 = vmax.f32 %v223_v38, 0.0  ;;  %v473_v38 = vld [vmem:[%s633_s7 + $0x8] sm:$0xff] }
 0x268   :  { %399 = vmatpush.bf16.msrb.mxu1 %v473_v38 }
 0x269   :  { %v225_v40 = vpack.c.bf16 %v224_v39, %v224_v39 }
 0x26b   :  { %444 = vmatmul.msk.bf16.vlgmr.msra.gmra.mxu3 %vm93_vm3, %v225_v40 }
 0x2ee   :  { %v254_v41 = vpop.f32.mrf.mxu3 }
 0x2ef   :  { %v258_v42 = vsel %vm93_vm3, %v254_v41, 0.0  ;;  %v266_v43 = vmul.f32 %v254_v41, %v254_v41 }
 0x2f0   :  { %v259_v44 = vrot.slane %v258_v42, 4 }
 0x2f1   :  { %v267_v45 = vsel %vm93_vm3, %v266_v43, 0.0 }
 0x2f2   :  { %v260_v46 = vadd.f32 %v259_v44, %v258_v42  ;;  %v268_v47 = vrot.slane %v267_v45, 4  ;;  %v472_v42 = vld [vmem:[%s633_s7] sm:$0xff] }
 0x2f3   :  { %400 = vmatpush.bf16.msrb.mxu1 %v472_v42 }
 0x2f4   :  { %v261_v48 = vrot.slane %v260_v46, 2  ;;  %v269_v49 = vadd.f32 %v268_v47, %v267_v45 }
 0x2f6   :  { %v262_v50 = vadd.f32 %v261_v48, %v260_v46  ;;  %v270_v51 = vrot.slane %v269_v49, 2  ;;  %v256_v52 = vpop.f32.mrf.mxu3 }
 0x2f8   :  { %v263_v53 = vrot.slane %v262_v50, 1  ;;  %v271_v54 = vadd.f32 %v270_v51, %v269_v49 }
 0x2fa   :  { %v264_v55 = vadd.f32 %v263_v53, %v262_v50  ;;  %v272_v56 = vrot.slane %v271_v54, 1  ;;  %v352_v50 = vld [vmem:[%s629_s8 + $0x3] sm:$0x1] }
 0x2fc   :  { %v265_v57 = vmul.f32 0.125, %v264_v55  ;;  %v273_v58 = vadd.f32 %v272_v56, %v271_v54  ;;  %v365_v54 = vld [vmem:[%s630_s9 + $0x3] sm:$0x1] }
 0x2fe   :  { %v274_v60 = vmul.f32 0.125, %v273_v58  ;;  %v275_v61 = vmul.f32 %v265_v57, %v265_v57 }
 0x300   :  { %v276_v62 = vsub.f32 %v274_v60, %v275_v61 }
 0x302   :  { %v277_v0 = vmax.f32 %v276_v62, 0.0 }
 0x304   :  { %v279_v1 = vadd.f32 1e-05, %v277_v0 }
 0x306   :  { %481 = vrsqrt.f32 %v279_v1  ;;  %vm286_vm11 = vweird.f32 %v279_v1 }
 0x30c   :  { %v482_v2 = vpop.eup %481 }
 0x30d   :  { %v281_v3 = vmul.f32 %v482_v2, %v279_v1  ;;  %vm287_vm10 = vweird.f32 %v482_v2 }
 0x30e   :  { %vm288_vm12 = vmor %vm286_vm11, %vm287_vm10 }
 0x30f   :  { %v282_v4 = vmul.f32 %v482_v2, %v281_v3 }
 0x311   :  { %v283_v5 = vmul.f32 0.5, %v282_v4 }
 0x313   :  { %v284_v6 = vsub.f32 1.5, %v283_v5 }
 0x315   :  { %v285_v8 = vmul.f32 %v482_v2, %v284_v6 }
 0x317   :  { %v289_v9 = vsel %vm288_vm12, %v482_v2, %v285_v8 }
 0x318   :  { %v290_v10 = vmul.f32 %v289_v9, %v278_v7 }
 0x31a   :  { %v292_v12 = vmul.f32 %v290_v10, %v265_v57  ;;  %v294_v13 = vperm.slane %v290_v10, 0 }
 0x31c   :  { %v293_v14 = vsub.f32 %v291_v11, %v292_v12  ;;  %v295_v15 = vmul.f32 %v294_v13, %v254_v41 }
 0x31e   :  { %v296_v16 = vperm.slane %v293_v14, 0 }
 0x320   :  { %v297_v17 = vadd.f32 %v296_v16, %v295_v15 }
 0x322   :  { %v298_v18 = vmax.f32 %v297_v17, 0.0 }
 0x324   :  { %v299_v19 = vpack.c.bf16 %v298_v18, %v298_v18 }
 0x326   :  { %453 = vmatmul.msk.bf16.vlgmr.msrb.gmra.mxu0 %vm93_vm3, %v299_v19 }
 0x3a3   :  { %v328_v20 = vpop.f32.mrf.mxu0 }
 0x3a4   :  { %v332_v21 = vsel %vm93_vm3, %v328_v20, 0.0  ;;  %v340_v22 = vmul.f32 %v328_v20, %v328_v20 }
 0x3a5   :  { %v333_v23 = vrot.slane %v332_v21, 4 }
 0x3a6   :  { %v341_v24 = vsel %vm93_vm3, %v340_v22, 0.0 }
 0x3a7   :  { %v334_v25 = vadd.f32 %v333_v23, %v332_v21  ;;  %v342_v26 = vrot.slane %v341_v24, 4 }
 0x3a9   :  { %v335_v27 = vrot.slane %v334_v25, 2  ;;  %v343_v28 = vadd.f32 %v342_v26, %v341_v24 }
 0x3ab   :  { %v336_v29 = vadd.f32 %v335_v27, %v334_v25  ;;  %v344_v30 = vrot.slane %v343_v28, 2  ;;  %v330_v31 = vpop.f32.mrf.mxu0 }
 0x3ad   :  { %v337_v32 = vrot.slane %v336_v29, 1  ;;  %v345_v33 = vadd.f32 %v344_v30, %v343_v28 }
 0x3af   :  { %v338_v34 = vadd.f32 %v337_v32, %v336_v29  ;;  %v346_v35 = vrot.slane %v345_v33, 1 }
 0x3b1   :  { %v339_v36 = vmul.f32 0.125, %v338_v34  ;;  %v347_v37 = vadd.f32 %v346_v35, %v345_v33 }
 0x3b3   :  { %v348_v39 = vmul.f32 0.125, %v347_v37  ;;  %v349_v40 = vmul.f32 %v339_v36, %v339_v36 }
 0x3b5   :  { %v350_v41 = vsub.f32 %v348_v39, %v349_v40 }
 0x3b7   :  { %v351_v43 = vmax.f32 %v350_v41, 0.0 }
 0x3b9   :  { %v353_v44 = vadd.f32 1e-05, %v351_v43 }
 0x3bb   :  { %483 = vrsqrt.f32 %v353_v44  ;;  %vm360_vm14 = vweird.f32 %v353_v44 }
 0x3c1   :  { %v484_v45 = vpop.eup %483 }
 0x3c2   :  { %v355_v46 = vmul.f32 %v484_v45, %v353_v44  ;;  %vm361_vm13 = vweird.f32 %v484_v45 }
 0x3c3   :  { %vm362_vm15 = vmor %vm360_vm14, %vm361_vm13 }
 0x3c4   :  { %v356_v47 = vmul.f32 %v484_v45, %v355_v46 }
 0x3c6   :  { %v357_v48 = vmul.f32 0.5, %v356_v47 }
 0x3c8   :  { %v358_v49 = vsub.f32 1.5, %v357_v48 }
 0x3ca   :  { %v359_v51 = vmul.f32 %v484_v45, %v358_v49 }
 0x3cc   :  { %v363_v52 = vsel %vm362_vm15, %v484_v45, %v359_v51 }
 0x3cd   :  { %v364_v53 = vmul.f32 %v363_v52, %v352_v50 }
 0x3cf   :  { %v366_v55 = vmul.f32 %v364_v53, %v339_v36  ;;  %v368_v56 = vperm.slane %v364_v53, 0 }
 0x3d1   :  { %v367_v57 = vsub.f32 %v365_v54, %v366_v55  ;;  %v369_v58 = vmul.f32 %v368_v56, %v328_v20 }
 0x3d3   :  { %v370_v59 = vperm.slane %v367_v57, 0 }
 0x3d5   :  { %v371_v60 = vadd.f32 %v370_v59, %v369_v58 }
 0x3d7   :  { %v372_v61 = vmax.f32 %v371_v60, 0.0 }
 0x3d9   :  { %v373_v62 = vpack.c.bf16 %v372_v61, %v372_v61 }
 0x3db   :  { %462 = vmatmul.msk.bf16.vlgmr.msrb.gmra.mxu1 %vm93_vm3, %v373_v62 }
 0x458   :  { %v402_v63 = vpop.f32.mrf.mxu1 }
 0x459   :  { %407 = vst.msk [vmem:[%s634_s10] sm:$0xff] %vm406_vm0, %v402_v63 }
 0x460   :  { %v404_v0 = vpop.f32.mrf.mxu1 }

</bundles_post_ra>
